<compile_context>
chip_gen: v6e
topology: v6e:2x2x1
jax: 0.10.0
libtpu: 0.0.40
codegen_flags: <defaults>
</compile_context>

<pallas_src>
from functools import partial

import jax
import jax.numpy as jnp
from jax.experimental import pallas as pl
from jax.experimental.pallas import tpu as pltpu

EPS = 1e-5  # nn.InstanceNorm2d default


# --------------------------------------------------------------------------- #
# Kernels
# --------------------------------------------------------------------------- #
def _cin_kernel_resident(x_ref, gb_ref, o_ref, *, inv_hw, hw):
    """Whole (rows, H*W) row block resident in VMEM. Two-pass variance."""
    x = x_ref[...].astype(jnp.float32)

    # Pass 1: mean (padded lanes are zeros -> contribute nothing to the sum).
    mean = jnp.sum(x, axis=-1, keepdims=True) * inv_hw

    # Pass 2: centered variance (numerically robust vs. E[x^2]-E[x]^2).
    d = x - mean
    if x_ref.shape[-1] != hw:  # lane padding present -> mask padded lanes
        lane = jax.lax.broadcasted_iota(jnp.int32, x.shape, x.ndim - 1)
        d = jnp.where(lane < hw, d, 0.0)
    var = jnp.sum(d * d, axis=-1, keepdims=True) * inv_hw
    inv_std = jax.lax.rsqrt(var + EPS)

    gamma = gb_ref[:, 0:1].astype(jnp.float32)
    beta = gb_ref[:, 1:2].astype(jnp.float32)
    scale = gamma * inv_std            # (rows, 1)
    shift = beta - mean * scale        # (rows, 1)

    if o_ref.dtype == jnp.bfloat16:
        # f32 reductions above; bf16 elementwise pass (half the vld/VALU work).
        o_ref[...] = (x_ref[...] * scale.astype(jnp.bfloat16)
                      + shift.astype(jnp.bfloat16))
    else:
        o_ref[...] = (x * scale + shift).astype(o_ref.dtype)


def _cin_kernel_spatial(x_ref, gb_ref, o_ref, sum_ref, ssq_ref, *, inv_hw):
    """Large H*W: grid = (row_blocks, 2 passes, spatial_blocks).

    Pass 0 accumulates sum / sum_sq into (rows, 1) scratch; pass 1 re-reads x
    and writes the normalized+affine output (2 HBM reads + 1 write total).
    """
    p = pl.program_id(1)
    j = pl.program_id(2)
    last_j = pl.num_programs(2) - 1

    x = x_ref[...].astype(jnp.float32)

    @pl.when((p == 0) & (j == 0))
    def _():
        sum_ref[...] = jnp.zeros_like(sum_ref)
        ssq_ref[...] = jnp.zeros_like(ssq_ref)

    @pl.when(p == 0)
    def _():
        sum_ref[...] += jnp.sum(x, axis=-1, keepdims=True)
        ssq_ref[...] += jnp.sum(x * x, axis=-1, keepdims=True)

    @pl.when((p == 0) & (j == last_j))
    def _():
        mean = sum_ref[...] * inv_hw
        var = jnp.maximum(ssq_ref[...] * inv_hw - mean * mean, 0.0)
        inv_std = jax.lax.rsqrt(var + EPS)
        gamma = gb_ref[:, 0:1].astype(jnp.float32)
        beta = gb_ref[:, 1:2].astype(jnp.float32)
        scale = gamma * inv_std
        shift = beta - mean * scale
        sum_ref[...] = scale           # reuse scratch: scale for pass 1
        ssq_ref[...] = shift           # reuse scratch: shift for pass 1

    @pl.when(p == 1)
    def _():
        scale = sum_ref[...]
        shift = ssq_ref[...]
        if o_ref.dtype == jnp.bfloat16:
            o_ref[...] = (x_ref[...] * scale.astype(jnp.bfloat16)
                          + shift.astype(jnp.bfloat16))
        else:
            o_ref[...] = (x * scale + shift).astype(o_ref.dtype)


# --------------------------------------------------------------------------- #
# Tiling heuristics
# --------------------------------------------------------------------------- #
def _pick_rows_per_block(total_rows, row_bytes, target_bytes):
    """Multiple of 8 (or full), <= byte target, >= 2 grid blocks when possible,
    preferring an exact divisor of total_rows (no padded trailing block)."""
    if total_rows <= 8:
        return total_rows
    cap = max(8, (min(total_rows, int(target_bytes // max(row_bytes, 1))) // 8) * 8)
    # >= 2 grid blocks so v7x's two TensorCores both get work; one extra grid
    # step (~0.35 us) is noise on single-TC generations.
    two_block_cap = max(8, (((total_rows + 1) // 2) // 8) * 8)
    cap = min(cap, two_block_cap)
    if total_rows % 8 == 0:
        for rows in range(cap, 7, -8):
            if total_rows % rows == 0:
                return rows
    return cap


def _pick_hw_block(hw_padded, rows, itemsize, target_bytes):
    """Largest multiple-of-128 divisor of the (128-padded) lane dim that keeps
    rows*hw_block near the byte target."""
    max_lanes = max(128, (int(target_bytes // max(rows * itemsize, 1)) // 128) * 128)
    if hw_padded <= max_lanes:
        return hw_padded
    best = 128
    lanes = 128
    while lanes <= max_lanes:
        if hw_padded % lanes == 0:
            best = lanes
        lanes += 128
    return best


def _vmem_limit_bytes(block_bytes):
    # in + out double-buffered (~4x block) plus f32 temporaries; clamp so the
    # request is safe on every generation (v7x has only 64 MiB physical VMEM).
    return int(min(48 << 20, max(32 << 20, 8 * block_bytes)))


# --------------------------------------------------------------------------- #
# Wrapper
# --------------------------------------------------------------------------- #
def conditional_instance_norm_2d(x, style_index, embed_weight, num_features,
                                 *, target_block_bytes=4 << 20, donate_x=False):
    """x: (N, C, H, W); style_index: (N,) int32; embed_weight: (num_classes, 2*C)."""
    N, C, H, W = x.shape
    assert C == num_features
    HW = H * W
    R = N * C
    itemsize = x.dtype.itemsize

    # Embedding lookup (tiny glue) + pack gamma/beta into one (R, 2) array so a
    # single small DMA per grid step feeds both.
    emb = embed_weight[style_index]                          # (N, 2*C)
    gamma = emb[:, :num_features]                            # (N, C)
    beta = emb[:, num_features:]                             # (N, C)
    gb = jnp.stack([gamma, beta], axis=-1).reshape(R, 2).astype(jnp.float32)

    # Lane-dense flattening; pad the lane dim to a multiple of 128 so stores are
    # full, unmasked vst (biggest single measured layout lever).
    hw_p = ((HW + 127) // 128) * 128
    x2 = x.reshape(R, HW)
    if hw_p != HW:
        x2 = jnp.pad(x2, ((0, 0), (0, hw_p - HW)))

    row_bytes = hw_p * itemsize
    min_rows = R if R < 8 else 8
    use_spatial = min_rows * row_bytes > target_block_bytes
    inv_hw = 1.0 / HW
    io_alias = {0: 0} if donate_x else {}

    if not use_spatial:
        # -------- VMEM-resident rows: one read + one write, two-pass variance.
        rows = _pick_rows_per_block(R, row_bytes, target_block_bytes)
        block_bytes = rows * row_bytes
        x_spec = pl.BlockSpec((rows, hw_p), lambda i: (i, 0))
        gb_spec = pl.BlockSpec((rows, 2), lambda i: (i, 0))
        cost = pl.CostEstimate(flops=10 * R * hw_p, transcendentals=R,
                               bytes_accessed=2 * R * hw_p * itemsize + 8 * R)
        out2 = pl.pallas_call(
            partial(_cin_kernel_resident, inv_hw=inv_hw, hw=HW),
            out_shape=jax.ShapeDtypeStruct((R, hw_p), x.dtype),
            grid_spec=pltpu.PrefetchScalarGridSpec(
                num_scalar_prefetch=0,
                grid=(pl.cdiv(R, rows),),
                in_specs=[x_spec, gb_spec],
                out_specs=x_spec),
            compiler_params=pltpu.CompilerParams(
                dimension_semantics=("parallel",),
                vmem_limit_bytes=_vmem_limit_bytes(block_bytes)),
            cost_estimate=cost,
            input_output_aliases=io_alias,
        )(x2, gb)
    else:
        # -------- Large H*W: spatial grid axis + scratch accumulators, so huge
        # images never force 8-row / multi-MiB double-buffered blocks.
        hw_block = _pick_hw_block(hw_p, min_rows, itemsize, target_block_bytes)
        rows = _pick_rows_per_block(R, hw_block * itemsize, target_block_bytes)
        sb = hw_p // hw_block
        block_bytes = rows * hw_block * itemsize
        x_spec = pl.BlockSpec((rows, hw_block), lambda i, p, j: (i, j))
        gb_spec = pl.BlockSpec((rows, 2), lambda i, p, j: (i, 0))
        # During pass 0 the out index stays (i, 0) -> buffer stays resident and
        # is never written back until pass 1 fills it with real data.
        out_spec = pl.BlockSpec((rows, hw_block), lambda i, p, j: (i, j * p))
        cost = pl.CostEstimate(flops=10 * R * hw_p, transcendentals=R,
                               bytes_accessed=3 * R * hw_p * itemsize + 8 * R)
        out2 = pl.pallas_call(
            partial(_cin_kernel_spatial, inv_hw=inv_hw),
            out_shape=jax.ShapeDtypeStruct((R, hw_p), x.dtype),
            grid_spec=pltpu.PrefetchScalarGridSpec(
                num_scalar_prefetch=0,
                grid=(pl.cdiv(R, rows), 2, sb),
                in_specs=[x_spec, gb_spec],
                out_specs=out_spec,
                scratch_shapes=[pltpu.VMEM((rows, 1), jnp.float32),
                                pltpu.VMEM((rows, 1), jnp.float32)]),
            compiler_params=pltpu.CompilerParams(
                dimension_semantics=("parallel", "arbitrary", "arbitrary"),
                vmem_limit_bytes=_vmem_limit_bytes(block_bytes)),
            cost_estimate=cost,
            input_output_aliases=io_alias,
        )(x2, gb)
        # TODO(synk): the spatial path uses the single-pass sum/sum_sq variance
        # (two-pass would need a third HBM sweep); acceptable for activations.

    if hw_p != HW:
        out2 = out2[:, :HW]
    return out2.reshape(N, C, H, W)


# --------------------------------------------------------------------------- #
# Pure-JAX reference (PyTorch forward semantics)
# --------------------------------------------------------------------------- #
def _reference(x, style_index, embed_weight, num_features):
    mean = jnp.mean(x, axis=(2, 3), keepdims=True)
    var = jnp.mean((x - mean) ** 2, axis=(2, 3), keepdims=True)
    out = (x - mean) / jnp.sqrt(var + EPS)
    emb = embed_weight[style_index]
    gamma = emb[:, :num_features][:, :, None, None]
    beta = emb[:, num_features:][:, :, None, None]
    return gamma * out + beta


if __name__ == "__main__":
    key = jax.random.PRNGKey(0)

    def make_case(key, N, C, H, W, num_classes, offset):
        k_x, k_w, k_s = jax.random.split(key, 3)
        x = jax.random.normal(k_x, (N, C, H, W), dtype=jnp.float32) + offset
        # Parameter init matching the module's __init__:
        #   embed.weight[:, :C] ~ Normal(1, 0.02), embed.weight[:, C:] = 0
        gamma_part = 1.0 + 0.02 * jax.random.normal(k_w, (num_classes, C),
                                                    dtype=jnp.float32)
        beta_part = jnp.zeros((num_classes, C), dtype=jnp.float32)
        embed_weight = jnp.concatenate([gamma_part, beta_part], axis=1)
        style_index = jax.random.randint(k_s, (N,), 0, num_classes, dtype=jnp.int32)
        return x, style_index, embed_weight

    k1, k2 = jax.random.split(key)

    # Case 1: small shape -> VMEM-resident path (mild offset exercises the
    # two-pass variance without stressing f32 summation tolerances).
    N, C, H, W = 2, 4, 16, 16
    x, si, ew = make_case(k1, N, C, H, W, num_classes=3, offset=2.0)
    out = jax.block_until_ready(conditional_instance_norm_2d(x, si, ew, C))
    ref = _reference(x, si, ew, C)
    assert out.shape == (N, C, H, W)
    assert jnp.allclose(out, ref, atol=3e-5, rtol=3e-5), "resident path mismatch"

    # Case 2: force the spatial-reduction path with a tiny block budget
    # (exercises the large-H*W code path at a small, fast shape).
    N2, C2, H2, W2 = 2, 8, 32, 32
    x2, si2, ew2 = make_case(k2, N2, C2, H2, W2, num_classes=3, offset=0.0)
    out2 = jax.block_until_ready(
        conditional_instance_norm_2d(x2, si2, ew2, C2, target_block_bytes=16 * 1024))
    ref2 = _reference(x2, si2, ew2, C2)
    assert out2.shape == (N2, C2, H2, W2)
    assert jnp.allclose(out2, ref2, atol=3e-5, rtol=3e-5), "spatial path mismatch"

    print("KERNEL_OK")
</pallas_src>

<mosaic_0001>
module attributes {stable_mosaic.version = 11 : i64} {
  func.func @_cin_kernel_resident(%arg0: i32, %arg1: memref<8x256xf32, #tpu.memory_space<vmem>>, %arg2: memref<8x2xf32, #tpu.memory_space<vmem>>, %arg3: memref<8x256xf32, #tpu.memory_space<vmem>>) attributes {dimension_semantics = [#tpu.dimension_semantics<parallel>], iteration_bounds = array<i64: 1>, scalar_prefetch = 0 : i64, scratch_operands = 0 : i64, tpu.core_type = #tpu.core_type<tc>, window_params = [{transform_indices = @transform_0, window_bounds = array<i64: 8, 256>}, {transform_indices = @transform_1, window_bounds = array<i64: 8, 2>}, {transform_indices = @transform_2, window_bounds = array<i64: 8, 256>}]} {
    %c0 = arith.constant 0 : index
    %c0_0 = arith.constant 0 : index
    %0 = vector.load %arg1[%c0, %c0_0] : memref<8x256xf32, #tpu.memory_space<vmem>>, vector<8x256xf32>
    %cst = arith.constant dense<0.000000e+00> : vector<8xf32>
    %1 = vector.multi_reduction <add>, %0, %cst [1] : vector<8x256xf32> to vector<8xf32>
    %2 = vector.shape_cast %1 : vector<8xf32> to vector<8x1xf32>
    %cst_1 = arith.constant 3.906250e-03 : f32
    %3 = vector.broadcast %cst_1 : f32 to vector<8x1xf32>
    %4 = arith.mulf %2, %3 : vector<8x1xf32>
    %5 = vector.broadcast %4 : vector<8x1xf32> to vector<8x256xf32>
    %6 = arith.subf %0, %5 : vector<8x256xf32>
    %7 = arith.mulf %6, %6 : vector<8x256xf32>
    %cst_2 = arith.constant dense<0.000000e+00> : vector<8xf32>
    %8 = vector.multi_reduction <add>, %7, %cst_2 [1] : vector<8x256xf32> to vector<8xf32>
    %9 = vector.shape_cast %8 : vector<8xf32> to vector<8x1xf32>
    %cst_3 = arith.constant 3.906250e-03 : f32
    %10 = vector.broadcast %cst_3 : f32 to vector<8x1xf32>
    %11 = arith.mulf %9, %10 : vector<8x1xf32>
    %cst_4 = arith.constant 9.99999974E-6 : f32
    %12 = vector.broadcast %cst_4 : f32 to vector<8x1xf32>
    %13 = arith.addf %11, %12 : vector<8x1xf32>
    %14 = math.rsqrt %13 : vector<8x1xf32>
    %c0_5 = arith.constant 0 : index
    %c0_6 = arith.constant 0 : index
    %15 = vector.load %arg2[%c0_5, %c0_6] : memref<8x2xf32, #tpu.memory_space<vmem>>, vector<8x1xf32>
    %c0_7 = arith.constant 0 : index
    %c1 = arith.constant 1 : index
    %16 = vector.load %arg2[%c0_7, %c1] : memref<8x2xf32, #tpu.memory_space<vmem>>, vector<8x1xf32>
    %17 = arith.mulf %15, %14 : vector<8x1xf32>
    %18 = arith.mulf %4, %17 : vector<8x1xf32>
    %19 = arith.subf %16, %18 : vector<8x1xf32>
    %20 = vector.broadcast %17 : vector<8x1xf32> to vector<8x256xf32>
    %21 = arith.mulf %0, %20 : vector<8x256xf32>
    %22 = vector.broadcast %19 : vector<8x1xf32> to vector<8x256xf32>
    %23 = arith.addf %21, %22 : vector<8x256xf32>
    %c0_8 = arith.constant 0 : index
    %c0_9 = arith.constant 0 : index
    %24 = vector.load %arg3[%c0_8, %c0_9] : memref<8x256xf32, #tpu.memory_space<vmem>>, vector<8x256xf32>
    tpu.vector_store %arg3[%c0_8, %c0_9], %23 {strides = array<i32>} : memref<8x256xf32, #tpu.memory_space<vmem>>, vector<8x256xf32>,
    return
  }
  func.func @transform_0(%arg0: i32) -> (i32, i32) {
    %c0_i32 = arith.constant 0 : i32
    %c0_i32_0 = arith.constant 0 : i32
    return %arg0, %c0_i32 : i32, i32
  }
  func.func @transform_1(%arg0: i32) -> (i32, i32) {
    %c0_i32 = arith.constant 0 : i32
    %c0_i32_0 = arith.constant 0 : i32
    return %arg0, %c0_i32 : i32, i32
  }
  func.func @transform_2(%arg0: i32) -> (i32, i32) {
    %c0_i32 = arith.constant 0 : i32
    %c0_i32_0 = arith.constant 0 : i32
    return %arg0, %c0_i32 : i32, i32
  }
}

</mosaic_0001>

<bundles_post_ra>
// kernel: tpu_custom_call.1
= control target key start
LH: loop header
LB: loop body
LE: loop exit
PB: predicated region body
PF: predicated region fallthrough
CT: control target
= control target key end

     0   :  { %7 = vsyncpa [#allocation3], 0  ;;  %s161_s0 = inlined_call_operand.hbm [shape: f32[8,256], index: 0, kind: input, shape index: {}]   ;;  %s162_s1 = inlined_call_operand.vmem [shape: f32[8,2], index: 1, kind: input, shape index: {}]   ;;  %s163_s2 = inlined_call_operand.hbm [shape: f32[8,256], index: 2, kind: output, shape index: {}]  }
   0x1   :  { %8 = vsyncpa [#allocation4], 0  ;;  %s132_s9 = smov [#allocation2]  }
   0x2   :  { %s15_s10 = sshll.u32 %s132_s9, 4  ;;  %s16_s10 = int_to_ptr.vmem [resolvable:$true] %s15_s10 }
   0x3   :  { %s96_s11 = scalar_lea.vmem %s16_s10, 256  ;;  %p101_p1 = scmp.lt.s32.totalorder %s16_s10, %s16_s10 }
   0x4   :  { %p97_p0 = scmp.ne.s32.totalorder %s16_s10, %s96_s11  ;;  %p102_p2 = scmp.lt.s32.totalorder %s96_s11, %s96_s11 }
   0x6   :  { %p103_p3 = por %p102_p2, %p101_p1 }
   0x8   :  { %p104_p4 = pnand %p103_p3, %p97_p0 }
   0xa   :  { %107 = shalt.err (!%p104_p4)
}
   0xb   :  { %18 = dma.hbm_to_vmem [thread:$0]  %s161_s0, 256, %s16_s10, [#allocation3]  }
   0xc   :  { %128 = dma.done.wait [#allocation3], 256  }
   0xd   :  { %129 = vsyncadd [#allocation3], 4294967040  ;;  %v24_v0 = vld [vmem:[#allocation2] sm:$0xff]  ;;  %v25_v1 = vld [vmem:[#allocation2 + $0x8] sm:$0xff]  ;;  %v133_v10 = vmov 0   ;;  %v134_v14 = vmov 1  }
   0xe   :  { %v26_v2 = vadd.f32 %v25_v1, %v24_v0  ;;  %84 = vset.pattern.permute.xlu1 %v133_v10  ;;  %85 = vset.pattern.permute.xlu0 %v134_v14  ;;  %v40_v15 = vld [vmem:[%s162_s1] sm:$0xff]  ;;  %s135_s15 = smov 1   ;;  %s136_s16 = smov [#allocation5]  }
   0xf   :  { %s70_s17 = sshll.u32 %s136_s16, 4  ;;  %s71_s17 = int_to_ptr.vmem [resolvable:$true] %s70_s17 }
  0x10   :  { %27 = vadd.xlane.f32.xlu0 %v26_v2  ;;  %s108_s1 = scalar_lea.vmem %s71_s17, 256  ;;  %p113_p6 = scmp.lt.s32.totalorder %s71_s17, %s71_s17 }
  0x11   :  { %p109_p5 = scmp.ne.s32.totalorder %s71_s17, %s108_s1  ;;  %p114_p7 = scmp.lt.s32.totalorder %s108_s1, %s108_s1 }
  0x13   :  { %p115_p8 = por %p114_p7, %p113_p6 }
  0x15   :  { %p116_p9 = pnand %p115_p8, %p109_p5 }
  0x99   :  { %v28_v3 = vpop.xlane.xlu0 %27 }
  0x9a   :  { %v29_v4 = vmul.f32 0.00390625, %v28_v3 }
  0x9c   :  { %v30_v5 = vsub.f32 %v24_v0, %v29_v4  ;;  %v31_v6 = vsub.f32 %v25_v1, %v29_v4 }
  0x9e   :  { %v32_v7 = vmul.f32 %v30_v5, %v30_v5  ;;  %v33_v8 = vmul.f32 %v31_v6, %v31_v6 }
  0xa0   :  { %v34_v9 = vadd.f32 %v33_v8, %v32_v7 }
  0xa2   :  { %35 = vadd.xlane.f32.xlu0 %v34_v9 }
 0x12b   :  { %v36_v11 = vpop.xlane.xlu0 %35 }
 0x12c   :  { %v37_v12 = vmul.f32 0.00390625, %v36_v11 }
 0x12e   :  { %v38_v13 = vadd.f32 1e-05, %v37_v12 }
 0x130   :  { %86 = vrsqrt.f32 %v38_v13 }
 0x13d   :  { %v87_v16 = vpop.eup %86 }
 0x13e   :  { %v41_v17 = vmul.f32 %v87_v16, %v40_v15 }
 0x140   :  { %v42_v18 = vmul.f32 %v41_v17, %v29_v4 }
 0x142   :  { %44 = vrot.lane.b32.xlu1 %v42_v18, %s135_s15 }
 0x146   :  { %50 = vperm.xlu1 %84, %v41_v17  }
 0x1b4   :  { %v45_v19 = vpop.permute.xlu1 %44 }
 0x1b5   :  { %v47_v20 = vsub.f32 %v40_v15, %v45_v19 }
 0x1b7   :  { %57 = vperm.xlu0 %85, %v47_v20  }
 0x1c1   :  { %v51_v21 = vpop.permute.xlu1 %50 }
 0x1c2   :  { %v53_v22 = vmul.f32 %v51_v21, %v24_v0  ;;  %v54_v23 = vmul.f32 %v51_v21, %v25_v1 }
 0x232   :  { %v58_v24 = vpop.permute.xlu0 %57 }
 0x233   :  { %v60_v25 = vadd.f32 %v58_v24, %v53_v22  ;;  %v61_v26 = vadd.f32 %v58_v24, %v54_v23 }
 0x235   :  { %62 = vst [vmem:[#allocation5] sm:$0xff] %v60_v25  ;;  %63 = vst [vmem:[#allocation5 + $0x8] sm:$0xff] %v61_v26 }
 0x236   :  { %119 = shalt.err (!%p116_p9)
}
 0x237   :  { %73 = dma.vmem_to_hbm [thread:$0]  %s71_s17, 256, %s163_s2, [#allocation4]  }
 0x238   :  { %130 = dma.done.wait [#allocation4], 256  }
 0x239   :  { %131 = vsyncadd [#allocation4], 4294967040 }
 0x23a   :  { %77 = vsyncpa [#allocation3], 1 }
 0x23b   :  { %78 = vsyncpa [#allocation4], 1 }

</bundles_post_ra>
